<compile_context>
chip_gen: v7x
topology: tpu7x:2x2x1
jax: 0.10.0
libtpu: 0.0.40
codegen_flags: <defaults>
</compile_context>

<pallas_src>
import functools

import jax
import jax.numpy as jnp
from jax.experimental import pallas as pl
from jax.experimental.pallas import tpu as pltpu


def _dice_kernel(predict_ref, target_ref, out_ref, inter_acc, union_acc, *,
                 smooth, hw_total, hw_tile, needs_mask):
    hw_idx = pl.program_id(1)

    @pl.when(hw_idx == 0)
    def _():
        inter_acc[...] = jnp.zeros_like(inter_acc)
        union_acc[...] = jnp.zeros_like(union_acc)

    p = predict_ref[...].astype(jnp.float32)          # (1, C, T)
    t = target_ref[...]                               # (1, 1, T) int32
    c = p.shape[1]

    # Numerically-stable softmax over the class (sublane) axis.  One EUP
    # reciprocal per pixel instead of a divide per (class, pixel); the C-wide
    # broadcasted multiply lands on the VALU slots, which have slack.
    m = jnp.max(p, axis=1, keepdims=True)             # (1, 1, T)
    e = jnp.exp(p - m)
    denom = jnp.sum(e, axis=1, keepdims=True)         # (1, 1, T)
    sm = e * pl.reciprocal(denom)                     # (1, C, T)

    # One-hot membership without materializing full (1, C, T) iota / one-hot
    # temporaries: a (1, C, 1) class iota broadcast against the target.
    cls = jax.lax.broadcasted_iota(jnp.int32, (1, c, 1), 1)
    hit = cls == t                                    # (1, C, T) bool

    if needs_mask:
        # Ragged last tile: padded lanes must not contribute to either the
        # one-hot counts (padded target == 0 would alias class 0) or sum(sm^2).
        col = (jax.lax.broadcasted_iota(jnp.int32, (1, 1, hw_tile), 2)
               + hw_idx * hw_tile)
        valid = col < hw_total                        # (1, 1, T) bool
        hit = hit & valid
        sm = jnp.where(valid, sm, 0.0)

    # Per-tile reductions over the lane axis, accumulated into (1, C) scratch.
    inter_acc[...] += jnp.sum(jnp.where(hit, sm, 0.0), axis=-1)
    union_acc[...] += (jnp.sum(sm * sm, axis=-1)
                       + jnp.sum(jnp.where(hit, 1.0, 0.0), axis=-1))

    @pl.when(hw_idx == pl.num_programs(1) - 1)
    def _():
        dice = (2.0 * inter_acc[...] + smooth) / (union_acc[...] + smooth)
        out_ref[...] = dice[:, None, :]               # (1, 1, C)


def dice_loss(predict, target, smooth=1e-5, hw_tile=2048, vmem_limit_bytes=None):
    """predict: [N, C, H, W] float; target: [N, H, W] integer class indices.

    hw_tile: lane-axis tile size (multiple of 128).  Sweep {1024, 2048, 4096}
    for large inputs; raise `vmem_limit_bytes` (e.g. 64<<20 on v5e/v6e) if a
    bigger tile is rejected by the default scoped-VMEM limit.
    """
    N, C, H, W = predict.shape
    HW = H * W

    # Lane-aligned tile, clamped to the (lane-padded) problem size.
    hw_tile = max(128, min(int(hw_tile), pl.cdiv(HW, 128) * 128))
    hw_tile = pl.cdiv(hw_tile, 128) * 128
    hw_pad = pl.cdiv(HW, hw_tile) * hw_tile
    needs_mask = hw_pad != HW

    p = predict.reshape(N, C, HW)                    # keep caller dtype (bf16 ok)
    t = target.reshape(N, 1, HW).astype(jnp.int32)
    if needs_mask:
        p = jnp.pad(p, ((0, 0), (0, 0), (0, hw_pad - HW)))
        t = jnp.pad(t, ((0, 0), (0, 0), (0, hw_pad - HW)))

    compiler_kwargs = dict(dimension_semantics=("parallel", "arbitrary"))
    if vmem_limit_bytes is not None:
        compiler_kwargs["vmem_limit_bytes"] = vmem_limit_bytes

    dice = pl.pallas_call(
        functools.partial(_dice_kernel, smooth=smooth, hw_total=HW,
                          hw_tile=hw_tile, needs_mask=needs_mask),
        out_shape=jax.ShapeDtypeStruct((N, 1, C), jnp.float32),
        grid=(N, hw_pad // hw_tile),
        in_specs=[
            pl.BlockSpec((1, C, hw_tile), lambda n, h: (n, 0, h)),
            pl.BlockSpec((1, 1, hw_tile), lambda n, h: (n, 0, h)),
        ],
        out_specs=pl.BlockSpec((1, 1, C), lambda n, h: (n, 0, 0)),
        scratch_shapes=[pltpu.VMEM((1, C), jnp.float32),
                        pltpu.VMEM((1, C), jnp.float32)],
        compiler_params=pltpu.CompilerParams(**compiler_kwargs),
    )(p, t)

    return 1.0 - jnp.mean(dice)


def dice_loss_ref(predict, target, smooth=1e-5):
    # Pure-JAX reference mirroring the PyTorch module (weight=None path).
    N, C, H, W = predict.shape
    p = jax.nn.softmax(predict.reshape(N, C, -1), axis=1)
    onehot = jax.nn.one_hot(target.reshape(N, -1), C, axis=1, dtype=p.dtype)
    inter = jnp.sum(p * onehot, axis=2)
    union = jnp.sum(p * p, axis=2) + jnp.sum(onehot, axis=2)
    dice = (2 * inter + smooth) / (union + smooth)
    return 1.0 - jnp.mean(dice)


if __name__ == "__main__":
    # TODO(synk): class-weight path of the module (dtype-mismatch quirk) is not
    # exercised; default DiceLoss(weight=None) semantics are implemented.
    key = jax.random.PRNGKey(0)
    k1, k2, k3, k4 = jax.random.split(key, 4)

    # Case 1: HW divisible by the tile, multiple HW tiles -> exercises the
    # init / accumulate / finalize pipeline (grid = (2, 2) with hw_tile=128).
    N, C, H, W = 2, 4, 16, 16
    predict = jax.random.normal(k1, (N, C, H, W), dtype=jnp.float32)
    target = jax.random.randint(k2, (N, H, W), 0, C, dtype=jnp.int32)
    loss = jax.block_until_ready(dice_loss(predict, target, hw_tile=128))
    ref = jax.block_until_ready(dice_loss_ref(predict, target))
    assert jnp.allclose(loss, ref, atol=1e-5, rtol=1e-5), (loss, ref)

    # Case 2: ragged HW (10*10 = 100 < 128) -> padded lanes masked in-kernel.
    N2, C2, H2, W2 = 2, 3, 10, 10
    predict2 = jax.random.normal(k3, (N2, C2, H2, W2), dtype=jnp.float32)
    target2 = jax.random.randint(k4, (N2, H2, W2), 0, C2, dtype=jnp.int32)
    loss2 = jax.block_until_ready(dice_loss(predict2, target2))
    ref2 = jax.block_until_ready(dice_loss_ref(predict2, target2))
    assert jnp.allclose(loss2, ref2, atol=1e-5, rtol=1e-5), (loss2, ref2)

    print("KERNEL_OK")
</pallas_src>

<mosaic_0001>
module attributes {stable_mosaic.version = 11 : i64} {
  func.func @_dice_kernel(%arg0: i32, %arg1: i32, %arg2: memref<1x4x128xf32, #tpu.memory_space<vmem>>, %arg3: memref<1x1x128xi32, #tpu.memory_space<vmem>>, %arg4: memref<1x1x4xf32, #tpu.memory_space<vmem>>, %arg5: memref<1x4xf32, #tpu.memory_space<vmem>>, %arg6: memref<1x4xf32, #tpu.memory_space<vmem>>) attributes {dimension_semantics = [#tpu.dimension_semantics<parallel>, #tpu.dimension_semantics<arbitrary>], iteration_bounds = array<i64: 2, 2>, scalar_prefetch = 0 : i64, scratch_operands = 2 : i64, tpu.core_type = #tpu.core_type<tc>, window_params = [{transform_indices = @transform_0, window_bounds = array<i64: 1, 4, 128>}, {transform_indices = @transform_1, window_bounds = array<i64: 1, 1, 128>}, {transform_indices = @transform_2, window_bounds = array<i64: 1, 1, 4>}]} {
    %c0_i32 = arith.constant 0 : i32
    %0 = arith.cmpi eq, %arg1, %c0_i32 : i32
    %1 = arith.extui %0 : i1 to i32
    %c0_i32_0 = arith.constant 0 : i32
    %2 = arith.cmpi ne, %1, %c0_i32_0 : i32
    scf.if %2 {
      %cst_22 = arith.constant 0.000000e+00 : f32
      %38 = vector.broadcast %cst_22 : f32 to vector<1x4xf32>
      %c0_23 = arith.constant 0 : index
      %c0_24 = arith.constant 0 : index
      %39 = vector.load %arg5[%c0_23, %c0_24] : memref<1x4xf32, #tpu.memory_space<vmem>>, vector<1x4xf32>
      tpu.vector_store %arg5[%c0_23, %c0_24], %38 {strides = array<i32>} : memref<1x4xf32, #tpu.memory_space<vmem>>, vector<1x4xf32>,
      %cst_25 = arith.constant 0.000000e+00 : f32
      %40 = vector.broadcast %cst_25 : f32 to vector<1x4xf32>
      %c0_26 = arith.constant 0 : index
      %c0_27 = arith.constant 0 : index
      %41 = vector.load %arg6[%c0_26, %c0_27] : memref<1x4xf32, #tpu.memory_space<vmem>>, vector<1x4xf32>
      tpu.vector_store %arg6[%c0_26, %c0_27], %40 {strides = array<i32>} : memref<1x4xf32, #tpu.memory_space<vmem>>, vector<1x4xf32>,
    } else {
    }
    %c0 = arith.constant 0 : index
    %c0_1 = arith.constant 0 : index
    %c0_2 = arith.constant 0 : index
    %3 = vector.load %arg2[%c0, %c0_1, %c0_2] : memref<1x4x128xf32, #tpu.memory_space<vmem>>, vector<1x4x128xf32>
    %c0_3 = arith.constant 0 : index
    %c0_4 = arith.constant 0 : index
    %c0_5 = arith.constant 0 : index
    %4 = vector.load %arg3[%c0_3, %c0_4, %c0_5] : memref<1x1x128xi32, #tpu.memory_space<vmem>>, vector<1x1x128xi32>
    %cst = arith.constant dense<0xFF800000> : vector<1x128xf32>
    %5 = vector.multi_reduction <maximumf>, %3, %cst [1] : vector<1x4x128xf32> to vector<1x128xf32>
    %6 = vector.shape_cast %5 : vector<1x128xf32> to vector<1x1x128xf32>
    %7 = vector.broadcast %6 : vector<1x1x128xf32> to vector<1x4x128xf32>
    %8 = arith.subf %3, %7 : vector<1x4x128xf32>
    %9 = math.exp %8 : vector<1x4x128xf32>
    %cst_6 = arith.constant dense<0.000000e+00> : vector<1x128xf32>
    %10 = vector.multi_reduction <add>, %9, %cst_6 [1] : vector<1x4x128xf32> to vector<1x128xf32>
    %11 = vector.shape_cast %10 : vector<1x128xf32> to vector<1x1x128xf32>
    %12 = tpu.reciprocal %11 : vector<1x1x128xf32> -> vector<1x1x128xf32>
    %13 = vector.broadcast %12 : vector<1x1x128xf32> to vector<1x4x128xf32>
    %14 = arith.mulf %9, %13 : vector<1x4x128xf32>
    %15 = tpu.iota {dimensions = array<i32: 1>} : vector<1x4x1xi32>
    %16 = vector.broadcast %15 : vector<1x4x1xi32> to vector<1x4x128xi32>
    %17 = vector.broadcast %4 : vector<1x1x128xi32> to vector<1x4x128xi32>
    %18 = arith.cmpi eq, %16, %17 : vector<1x4x128xi32>
    %c0_7 = arith.constant 0 : index
    %c0_8 = arith.constant 0 : index
    %19 = vector.load %arg5[%c0_7, %c0_8] : memref<1x4xf32, #tpu.memory_space<vmem>>, vector<1x4xf32>
    %cst_9 = arith.constant 0.000000e+00 : f32
    %20 = vector.broadcast %cst_9 : f32 to vector<1x4x128xf32>
    %21 = arith.select %18, %14, %20 : vector<1x4x128xi1>, vector<1x4x128xf32>
    %cst_10 = arith.constant dense<0.000000e+00> : vector<1x4xf32>
    %22 = vector.multi_reduction <add>, %21, %cst_10 [2] : vector<1x4x128xf32> to vector<1x4xf32>
    %23 = arith.addf %19, %22 : vector<1x4xf32>
    %c0_11 = arith.constant 0 : index
    %c0_12 = arith.constant 0 : index
    %24 = vector.load %arg5[%c0_11, %c0_12] : memref<1x4xf32, #tpu.memory_space<vmem>>, vector<1x4xf32>
    tpu.vector_store %arg5[%c0_11, %c0_12], %23 {strides = array<i32>} : memref<1x4xf32, #tpu.memory_space<vmem>>, vector<1x4xf32>,
    %c0_13 = arith.constant 0 : index
    %c0_14 = arith.constant 0 : index
    %25 = vector.load %arg6[%c0_13, %c0_14] : memref<1x4xf32, #tpu.memory_space<vmem>>, vector<1x4xf32>
    %26 = arith.mulf %14, %14 : vector<1x4x128xf32>
    %cst_15 = arith.constant dense<0.000000e+00> : vector<1x4xf32>
    %27 = vector.multi_reduction <add>, %26, %cst_15 [2] : vector<1x4x128xf32> to vector<1x4xf32>
    %cst_16 = arith.constant 1.000000e+00 : f32
    %cst_17 = arith.constant 0.000000e+00 : f32
    %28 = vector.broadcast %cst_16 : f32 to vector<1x4x128xf32>
    %29 = vector.broadcast %cst_17 : f32 to vector<1x4x128xf32>
    %30 = arith.select %18, %28, %29 : vector<1x4x128xi1>, vector<1x4x128xf32>
    %cst_18 = arith.constant dense<0.000000e+00> : vector<1x4xf32>
    %31 = vector.multi_reduction <add>, %30, %cst_18 [2] : vector<1x4x128xf32> to vector<1x4xf32>
    %32 = arith.addf %27, %31 : vector<1x4xf32>
    %33 = arith.addf %25, %32 : vector<1x4xf32>
    %c0_19 = arith.constant 0 : index
    %c0_20 = arith.constant 0 : index
    %34 = vector.load %arg6[%c0_19, %c0_20] : memref<1x4xf32, #tpu.memory_space<vmem>>, vector<1x4xf32>
    tpu.vector_store %arg6[%c0_19, %c0_20], %33 {strides = array<i32>} : memref<1x4xf32, #tpu.memory_space<vmem>>, vector<1x4xf32>,
    %c1_i32 = arith.constant 1 : i32
    %35 = arith.cmpi eq, %arg1, %c1_i32 : i32
    %36 = arith.extui %35 : i1 to i32
    %c0_i32_21 = arith.constant 0 : i32
    %37 = arith.cmpi ne, %36, %c0_i32_21 : i32
    scf.if %37 {
      %c0_22 = arith.constant 0 : index
      %c0_23 = arith.constant 0 : index
      %38 = vector.load %arg5[%c0_22, %c0_23] : memref<1x4xf32, #tpu.memory_space<vmem>>, vector<1x4xf32>
      %cst_24 = arith.constant 2.000000e+00 : f32
      %39 = vector.broadcast %cst_24 : f32 to vector<1x4xf32>
      %40 = arith.mulf %39, %38 : vector<1x4xf32>
      %cst_25 = arith.constant 9.99999974E-6 : f32
      %41 = vector.broadcast %cst_25 : f32 to vector<1x4xf32>
      %42 = arith.addf %40, %41 : vector<1x4xf32>
      %c0_26 = arith.constant 0 : index
      %c0_27 = arith.constant 0 : index
      %43 = vector.load %arg6[%c0_26, %c0_27] : memref<1x4xf32, #tpu.memory_space<vmem>>, vector<1x4xf32>
      %cst_28 = arith.constant 9.99999974E-6 : f32
      %44 = vector.broadcast %cst_28 : f32 to vector<1x4xf32>
      %45 = arith.addf %43, %44 : vector<1x4xf32>
      %46 = arith.divf %42, %45 : vector<1x4xf32>
      %47 = vector.shape_cast %46 : vector<1x4xf32> to vector<1x1x4xf32>
      %c0_29 = arith.constant 0 : index
      %c0_30 = arith.constant 0 : index
      %c0_31 = arith.constant 0 : index
      %48 = vector.load %arg4[%c0_29, %c0_30, %c0_31] : memref<1x1x4xf32, #tpu.memory_space<vmem>>, vector<1x1x4xf32>
      tpu.vector_store %arg4[%c0_29, %c0_30, %c0_31], %47 {strides = array<i32>} : memref<1x1x4xf32, #tpu.memory_space<vmem>>, vector<1x1x4xf32>,
    } else {
    }
    return
  }
  func.func @transform_0(%arg0: i32, %arg1: i32) -> (i32, i32, i32) {
    %c0_i32 = arith.constant 0 : i32
    %c0_i32_0 = arith.constant 0 : i32
    return %arg0, %c0_i32, %arg1 : i32, i32, i32
  }
  func.func @transform_1(%arg0: i32, %arg1: i32) -> (i32, i32, i32) {
    %c0_i32 = arith.constant 0 : i32
    %c0_i32_0 = arith.constant 0 : i32
    return %arg0, %c0_i32, %arg1 : i32, i32, i32
  }
  func.func @transform_2(%arg0: i32, %arg1: i32) -> (i32, i32, i32) {
    %c0_i32 = arith.constant 0 : i32
    %c0_i32_0 = arith.constant 0 : i32
    %c0_i32_1 = arith.constant 0 : i32
    return %arg0, %c0_i32, %c0_i32_0 : i32, i32, i32
  }
}

</mosaic_0001>

<bundles_post_ra>
// kernel: tpu_custom_call.1
= control target key start
LH: loop header
LB: loop body
LE: loop exit
PB: predicated region body
PF: predicated region fallthrough
CT: control target
= control target key end

     0   :  { %s1150_s0 = inlined_call_operand.hbm [shape: f32[2,4,256], index: 0, kind: input, shape index: {}]   ;;  %s1151_s1 = inlined_call_operand.hbm [shape: s32[2,1,256], index: 1, kind: input, shape index: {}]   ;;  %s1152_s2 = inlined_call_operand.hbm [shape: f32[2,1,4], index: 2, kind: output, shape index: {}]  }
   0x1   :  { %1157 = sst [smem:[#allocation15_spill]] %s1150_s0 }
   0x2   :  { %7 = vsyncpa [#allocation5], 0 }
   0x3   :  { %9 = vsyncpa [#allocation5 + $0x1], 0 }
   0x4   :  { %10 = vsyncpa [#allocation8], 0 }
   0x5   :  { %12 = vsyncpa [#allocation8 + $0x1], 0 }
   0x6   :  { %13 = vsyncpa [#allocation6], 0 }
   0x7   :  { %15 = vsyncpa [#allocation6 + $0x1], 0  ;;  %s868_s9 = smov 0   ;;  %s870_s10 = smov 0  }
   0x8   :  { %s872_s11 = smov 0   ;;  %s874_s12 = smov 0  }
   0x9   :  { %s876_s13 = smov 0   ;;  %s878_s14 = smov 0  }
   0xa   :  { %s880_s15 = smov 0   ;;  %s882_s16 = smov 0  }
   0xb   :  { %s884_s17 = smov 0   ;;  %s886_s18 = smov 0  }
   0xc   :  { %s888_s19 = smov 0  }
   0xd LB: > { %s522_s20 = sadd.s32 4294967295, %s844_s19   ;;  %s523_s21 = sadd.s32 4294967294, %s844_s19   ;;  %s844_s19 = sphi %s888_s19, %s21_s19   ;;  %s840_s18 = sphi %s886_s18, %s1184_s18   ;;  %s836_s17 = sphi %s884_s17, %s1183_s17   ;;  %s832_s16 = sphi %s882_s16, %s1182_s16   ;;  %s828_s15 = sphi %s880_s15, %s1181_s15   ;;  %s824_s14 = sphi %s878_s14, %s1180_s14   ;;  %s820_s13 = sphi %s876_s13, %s1179_s13   ;;  %s816_s12 = sphi %s874_s12, %s1178_s12   ;;  %s812_s11 = sphi %s872_s11, %s1177_s11   ;;  %s808_s10 = sphi %s870_s10, %s1176_s10   ;;  %s804_s9 = sphi %s868_s9, %s1175_s9  }
   0xe   : > { %s30_s22 = sadd.s32 1, %s836_s17  ;;  %s33_s23 = sadd.s32 1, %s840_s18 }
   0xf   : > { %p31_p0 = scmp.ge.s32.totalorder %s30_s22, 2  ;;  %s42_s24 = sadd.s32 1, %s824_s14 }
  0x10   : > { %p49_p1 = scmp.ne.s32.totalorder %s824_s14, %s820_s13  ;;  %p50_p2 = scmp.eq.s32.totalorder %s844_s19, 0 }
  0x11   : > { %s1186_s22 = smov (%p31_p0, %s30_s22), 0  ;;  %s1188_s23 = smov (!%p31_p0, %s33_s23), %s840_s18 }
  0x12   : > { %1158 = sst [smem:[#allocation13_spill]] %s1186_s22  ;;  %s38_s25 = ssub.s32 %s836_s17, %s1186_s22 }
  0x13   : > { %p934_p3 = por %p50_p2, %p49_p1  ;;  %p35_p4 = scmp.ge.s32.totalorder %s1188_s23, 2 }
  0x14   : > { %p55_p5 = scmp.ne.s32.totalorder %s820_s13, %s816_s12  ;;  %p56_p6 = scmp.eq.s32.totalorder %s522_s20, 0 }
  0x15   : > { %s96_s27 = sadd.s32 1, %s812_s11  ;;  %s1190_s23 = smov (%p35_p4, %s1188_s23), 0 }
  0x16   : > { %1160 = sst [smem:[#allocation14_spill]] %s1190_s23  ;;  %p942_p7 = por %p56_p6, %p55_p5 }
  0x17   : > { %p106_p8 = scmp.ne.s32.totalorder %s812_s11, %s808_s10  ;;  %s37_s29 = ssub.s32 %s840_s18, %s1190_s23 }
  0x18   : > { %s1161_s28 = scalar_select %p942_p7, 1, 0 }
  0x19   : > { %p107_p9 = scmp.eq.s32.totalorder %s522_s20, 3  ;;  %s39_s30 = sor.u32 %s38_s25, %s37_s29 }
  0x1a   : > { %p94_p10 = scmp.eq.s32.totalorder %s37_s29, 0  ;;  %p40_p11 = scmp.eq.s32.totalorder %s39_s30, 0 }
  0x1b   : > { %p950_p12 = por %p107_p9, %p106_p8  ;;  %p112_p13 = scmp.ne.s32.totalorder %s808_s10, %s804_s9 }
  0x1c   : > { %s955_s4 = scalar_select %p94_p10, %s812_s11, %s96_s27  }
  0x1d   : > { %s1162_s3 = scalar_select %p950_p12, 1, 0 }
  0x1e   : > { %s958_s5 = scalar_select %p40_p11, %s824_s14, %s42_s24  }
  0x1f   : > { %p113_p0 = scmp.eq.s32.totalorder %s523_s21, 3  ;;  %p556_p1 = scmp.lt.s32.totalorder %s844_s19, 4 }
  0x20   : > { %s968_s7 = sand.u32 1, %s824_s14   ;;  %s527_s12 = sshll.u32 %s840_s18, 1 }
  0x21   : > { %p963_p2 = por %p113_p0, %p112_p13  ;;  %s526_s8 = sshll.u32 %s968_s7, 2 }
  0x22   : > { %s973_s20 = sadd.s32 %s836_s17, %s527_s12  ;;  %s137_s25 = scalar_lea.vmem [#allocation4], %s526_s8 }
  0x23   : > { %s1163_s6 = scalar_select %p963_p2, 1, 0 }
  0x24   : > { %s146_s24 = sshll.u32 %s137_s25, 4  ;;  %s528_s27 = sshll.u32 %s973_s20, 6  ;;  %s976_s24 = int_to_ptr.vmem [resolvable:$true] %s146_s24 }
  0x25   : > { %s1164_s0 = sld [smem:[#allocation15_spill]]  ;;  %p985_p4 = pnand %p556_p1, %p934_p3 }
  0x26   : > { %s134_s8 = scalar_lea.sflag [#allocation5], %s968_s7 }
  0x27   : > { %p660_p9 = pneg %p985_p4 }
  0x2b   : > { %s981_s30 = scalar_lea.hbm %s1164_s0, %s528_s27  ;;  %s663_s27 = scalar_lea.hbm %s1164_s0, 256 }
  0x2c   : > { %s658_s12 = scalar_lea.hbm %s981_s30, 64  ;;  %p664_p3 = scmp.lt.u32.totalorder %s981_s30, %s1164_s0 }
  0x2d   : > { %p659_p8 = scmp.ne.s32.totalorder %s981_s30, %s658_s12  ;;  %p665_p13 = scmp.lt.u32.totalorder %s663_s27, %s658_s12 }
  0x2e   : > { %p667_p1 = scmp.lt.u32.totalorder %s658_s12, %s981_s30 }
  0x2f   : > { %p661_p10 = pnand %p660_p9, %p659_p8  ;;  %p666_p0 = por %p665_p13, %p664_p3 }
  0x31   : > { %p662_p11 = pneg %p661_p10  ;;  %p668_p5 = por %p667_p1, %p666_p0 }
  0x33   : > { %p669_p6 = pnand %p668_p5, %p662_p11 }
  0x35   : > { %672 = shalt.err (!%p669_p6)
}
  0x36   : > { %s673_s22 = scalar_lea.vmem %s976_s24, 64  ;;  %s846_s26 = smov [#allocation4]  }
  0x37   : > { %p674_p8 = scmp.ne.s32.totalorder %s976_s24, %s673_s22  ;;  %s678_s25 = sshll.u32 %s846_s26, 4  ;;  %s679_s25 = int_to_ptr.vmem [resolvable:$false] %s678_s25 }
  0x38   : > { %s680_s21 = scalar_lea.vmem %s679_s25, 128  ;;  %p681_p12 = scmp.lt.s32.totalorder %s976_s24, %s679_s25 }
  0x39   : > { %p676_p10 = pnand %p674_p8, %p660_p9  ;;  %p682_p3 = scmp.lt.s32.totalorder %s680_s21, %s673_s22 }
  0x3b   : > { %p677_p2 = pneg %p676_p10  ;;  %p683_p13 = por %p682_p3, %p681_p12 }
  0x3d   : > { %p684_p0 = pnand %p683_p13, %p677_p2 }
  0x3f   : > { %687 = shalt.err (!%p684_p0)
}
  0x40   : > { %548 = dma.hbm_to_vmem [thread:$0]  (!%p985_p4), %s981_s30, 64, %s976_s24, %s134_s8  }
  0x41   : > { %p1166_p5 = scmp.lt.s32.totalorder %s844_s19, 5  ;;  %p1167_p6 = scmp.ge.s32.totalorder %s844_s19, 1 }
  0x42   : > { %s530_s22 = sshll.u32 %s973_s20, 4  ;;  %s156_s27 = scalar_lea.vmem [#allocation7], %s968_s7 }
  0x43   : > { %p1021_p11 = pnand %p1167_p6, %p1166_p5  ;;  %s165_s29 = sshll.u32 %s156_s27, 4  ;;  %s166_s29 = int_to_ptr.vmem [resolvable:$true] %s165_s29 }
  0x44   : > { %s1030_s21 = scalar_lea.hbm %s1151_s1, %s530_s22  ;;  %s154_s24 = scalar_lea.sflag [#allocation8], %s968_s7 }
  0x45   : > { %s1168_s12 = scalar_select %p1021_p11, 1, 0 }
  0x46   : > { %s688_s30 = scalar_lea.hbm %s1030_s21, 16  ;;  %s693_s27 = scalar_lea.hbm %s1151_s1, 64 }
  0x47   : > { %p689_p12 = scmp.ne.s32.totalorder %s1030_s21, %s688_s30  ;;  %p694_p8 = scmp.lt.u32.totalorder %s1030_s21, %s1151_s1 }
  0x48   : > { %p695_p10 = scmp.lt.u32.totalorder %s693_s27, %s688_s30  ;;  %p697_p13 = scmp.lt.u32.totalorder %s688_s30, %s1030_s21 }
  0x49   : > { %p691_p2 = pnand %p689_p12, %p660_p9 }
  0x4a   : > { %p696_p3 = por %p695_p10, %p694_p8 }
  0x4b   : > { %p692_p1 = pneg %p691_p2 }
  0x4c   : > { %p698_p0 = por %p697_p13, %p696_p3 }
  0x4e   : > { %p699_p5 = pnand %p698_p0, %p692_p1 }
  0x50   : > { %702 = shalt.err (!%p699_p5)
}
  0x51   : > { %s703_s7 = scalar_lea.vmem %s166_s29, 16  ;;  %s847_s22 = smov [#allocation7]  }
  0x52   : > { %p704_p6 = scmp.ne.s32.totalorder %s166_s29, %s703_s7  ;;  %s708_s25 = sshll.u32 %s847_s22, 4  ;;  %s709_s25 = int_to_ptr.vmem [resolvable:$false] %s708_s25 }
  0x53   : > { %s710_s20 = scalar_lea.vmem %s709_s25, 32  ;;  %p711_p7 = scmp.lt.s32.totalorder %s166_s29, %s709_s25 }
  0x54   : > { %p706_p12 = pnand %p704_p6, %p660_p9  ;;  %p712_p11 = scmp.lt.s32.totalorder %s710_s20, %s703_s7 }
  0x56   : > { %p707_p2 = pneg %p706_p12  ;;  %p713_p8 = por %p712_p11, %p711_p7 }
  0x58   : > { %p714_p10 = pnand %p713_p8, %p707_p2 }
  0x5a   : > { %717 = shalt.err (!%p714_p10)
}
  0x5b   : > { %551 = dma.hbm_to_vmem [thread:$0]  (!%p985_p4), %s1030_s21, 16, %s166_s29, %s154_s24  }
  0x5c   : > { %p1169_p1 = scmp.ne.s32.totalorder %s1168_s12, 0 }
  0x5d   : > { %s1055_s0 = sand.u32 (!%p1169_p1), 1, %s820_s13   ;;  %p1170_p9 = scmp.ne.s32.totalorder (!%p1169_p1), %s1161_s28, 0 }
  0x5e   : > { %174 = sbr.rel (%p1169_p1) target bundleno = 514 (0x202), region = 28  ;;  %s532_s30 = sshll.u32 (!%p1169_p1), %s1055_s0, 2 }
  0x5f   : > { %s177_s8 = scalar_lea.sflag (!%p1169_p1), [#allocation5], %s1055_s0  ;;  %s180_s27 = scalar_lea.vmem (!%p1169_p1), [#allocation4], %s532_s30 }
  0x65   : > { %791 = dma.done.wait (%p1170_p9), %s177_s8, 64  }
  0x66   : > { %793 = vsyncadd (%p1170_p9), %s177_s8, 4294967232  ;;  %s186_s23 = scalar_lea.sflag [#allocation8], %s1055_s0  ;;  %s188_s12 = scalar_lea.vmem [#allocation7], %s1055_s0 }
  0x67   : > { %795 = dma.done.wait (%p1170_p9), %s186_s23, 16  }
  0x68   : > { %797 = vsyncadd (%p1170_p9), %s186_s23, 4294967280  ;;  %s210_s29 = sand.u32 1, %s808_s10   ;;  %p533_p7 = scmp.ne.s32.totalorder %s828_s15, 0 }
  0x69   : > { %s1072_s21 = scalar_lea.vmem [#allocation9], %s210_s29  ;;  %vm216_vm0 = vcmask (!%p533_p7), 24576   ;;  %v848_v0 = vmov (!%p533_p7), 0.0  }
  0x6a   : > { %215 = sbr.rel (%p533_p7) target bundleno = 113 (0x71), region = 40  ;;  %217 = vst.msk [vmem:[#allocation2] sm:$0x1] (!%p533_p7), %vm216_vm0, %v848_v0  ;;  %218 = vst.msk [vmem:[#allocation3] sm:$0x1] (!%p533_p7), %vm216_vm0, %v848_v0 }
  0x71 PF: > { %v219_v1 = vld [vmem:[%s180_s27] sm:$0xf]  ;;  %vm221_vm1 = vcmask 1043456   ;;  %v241_v19 = vlaneseq  ;;  %v534_v21 = vld [vmem:[%s188_s12] ss:$0 sm:$0xff]  ;;  %v849_v26 = vmov 0.0  }
  0x72   : > { %v222_v2 = vsel %vm221_vm1, %v219_v1, -inf  ;;  %v850_v31 = vmov 0   ;;  %v851_v32 = vmov 1966171168   ;;  %vm319_vm3 = vcmask 24576   ;;  %p535_p4 = scmp.ne.s32.totalorder %s828_s15, 1 }
  0x73   : > { %v223_v3 = vrot.slane %v222_v2, 4  ;;  %v242_v20 = vshrl.u32 %v241_v19, 7  ;;  %651 = vset.pattern.permute.xlu0 %v850_v31  ;;  %650 = vset.pattern.permute.xlu1 %v850_v31  ;;  %v273_v33 = vunpack.c.l.s4 %v851_v32  ;;  %v298_v0 = vand.u32 127, %v241_v19 }
  0x75   : > { %v224_v4 = vmax.f32 %v222_v2, %v223_v3  ;;  %vm247_vm2 = vcmp.eq.s32.totalorder %v242_v20, %v534_v21  ;;  %v274_v34 = vunpack.c.0.s8 %v273_v33  ;;  %v256_v35 = vsub.s32 0, %v242_v20 }
  0x76   : > { %v326_v27 = vsel %vm247_vm2, 1.0, %v849_v26  ;;  %v260_v36 = vsub.s32 1, %v242_v20  ;;  %v264_v37 = vsub.s32 2, %v242_v20  ;;  %v268_v38 = vsub.s32 3, %v242_v20 }
  0x77   : > { %v225_v5 = vrot.slane %v224_v4, 2  ;;  %v327_v30 = vsel %vm221_vm1, %v326_v27, 0.0  ;;  %v277_v39 = vsub.s32 %v274_v34, %v242_v20 }
  0x79   : > { %v226_v6 = vmax.f32 %v224_v4, %v225_v5  ;;  %v248_v5 = vld [vmem:[#allocation2] sm:$0x1] }
  0x7b   : > { %v227_v7 = vrot.slane %v226_v6, 1 }
  0x7d   : > { %v228_v8 = vmax.f32 %v226_v6, %v227_v7 }
  0x7f   : > { %v229_v9 = vsub.f32 %v219_v1, %v228_v8  ;;  %v301_v1 = vsub.s32 %v298_v0, %v242_v20 }
  0x81   : > { %v230_v10 = vmul.f32 1.442695, %v229_v9 }
  0x83   : > { %652 = vpow2.f32 %v230_v10 }
  0x8d   : > { %v653_v11 = vpop.eup %652 }
  0x8e   : > { %v232_v12 = vsel %vm221_vm1, %v653_v11, 0.0 }
  0x8f   : > { %v233_v13 = vrot.slane %v232_v12, 4 }
  0x91   : > { %v234_v14 = vadd.f32 %v233_v13, %v232_v12 }
  0x93   : > { %v235_v15 = vrot.slane %v234_v14, 2 }
  0x95   : > { %v236_v16 = vadd.f32 %v235_v15, %v234_v14 }
  0x97   : > { %v237_v17 = vrot.slane %v236_v16, 1 }
  0x99   : > { %v238_v18 = vadd.f32 %v237_v17, %v236_v16 }
  0x9b   : > { %654 = vrcp.f32 %v238_v18 }
  0xa5   : > { %v655_v22 = vpop.eup %654 }
  0xa6   : > { %v240_v23 = vmul.f32 %v655_v22, %v653_v11  ;;  %v321_v11 = vld [vmem:[#allocation3] sm:$0x1] }
  0xa8   : > { %v322_v24 = vmul.f32 %v240_v23, %v240_v23  ;;  %v249_v25 = vsel %vm247_vm2, %v240_v23, 0.0 }
  0xa9   : > { %v250_v28 = vsel %vm221_vm1, %v249_v25, 0.0 }
  0xaa   : > { %v323_v29 = vsel %vm221_vm1, %v322_v24, 0.0  ;;  %251 = vadd.xlane.f32.xlu1 %v250_v28 }
  0xab   : > { %324 = vadd.xlane.f32.xlu0 %v323_v29 }
  0xaf   : > { %328 = vadd.xlane.f32.xlu0 %v327_v30 }
 0x137   : > { %v252_v40 = vpop.xlane.xlu1 %251 }
 0x138   : > { %v325_v41 = vpop.xlane.xlu0 %324  ;;  %v257_v42 = vrot.slane %v252_v40, %v256_v35  ;;  %v261_v43 = vrot.slane %v252_v40, %v260_v36  ;;  %v265_v44 = vrot.slane %v252_v40, %v264_v37  ;;  %v269_v45 = vrot.slane %v252_v40, %v268_v38 }
 0x13a   : > { %v270_v46 = vcombine.low %v257_v42, %v261_v43  ;;  %v271_v47 = vcombine.low %v265_v44, %v269_v45 }
 0x13c   : > { %v329_v48 = vpop.xlane.xlu0 %328  ;;  %v278_v49 = vrot.slane %v270_v46, %v277_v39  ;;  %v285_v50 = vrot.slane %v271_v47, %v277_v39 }
 0x13d   : > { %v330_v51 = vadd.f32 %v329_v48, %v325_v41 }
 0x13e   : > { %v286_v52 = vcombine.low %v278_v49, %v285_v50 }
 0x13f   : > { %v335_v53 = vrot.slane %v330_v51, %v256_v35  ;;  %v339_v54 = vrot.slane %v330_v51, %v260_v36  ;;  %v343_v55 = vrot.slane %v330_v51, %v264_v37  ;;  %v347_v56 = vrot.slane %v330_v51, %v268_v38 }
 0x140   : > { %v293_v57 = vrot.slane %v286_v52, %v277_v39 }
 0x141   : > { %v348_v58 = vcombine.low %v335_v53, %v339_v54  ;;  %v349_v59 = vcombine.low %v343_v55, %v347_v56 }
 0x142   : > { %295 = vperm.xlu1 %650, %v293_v57  }
 0x143   : > { %v356_v60 = vrot.slane %v348_v58, %v277_v39  ;;  %v363_v61 = vrot.slane %v349_v59, %v277_v39 }
 0x145   : > { %v364_v62 = vcombine.low %v356_v60, %v363_v61 }
 0x147   : > { %v371_v63 = vrot.slane %v364_v62, %v277_v39 }
 0x149   : > { %373 = vperm.xlu0 %651, %v371_v63  }
 0x1c1   : > { %v296_v2 = vpop.permute.xlu1 %295 }
 0x1c2   : > { %v302_v3 = vrot.slane %v296_v2, %v301_v1 }
 0x1c4   : > { %v309_v4 = vrot.slane %v302_v3, %v277_v39 }
 0x1c6   : > { %v316_v6 = vrot.slane %v309_v4, %v277_v39 }
 0x1c8   : > { %v374_v7 = vpop.permute.xlu0 %373  ;;  %v318_v8 = vadd.f32 %v316_v6, %v248_v5 }
 0x1c9   : > { %v378_v9 = vrot.slane %v374_v7, %v301_v1 }
 0x1ca   : > { %320 = vst.msk [vmem:[#allocation2] sm:$0x1] %vm319_vm3, %v318_v8 }
 0x1cb   : > { %v385_v10 = vrot.slane %v378_v9, %v277_v39  ;;  %399 = sbr.rel (%p535_p4) target bundleno = 489 (0x1e9), region = 44 }
 0x1cd   : > { %v392_v12 = vrot.slane %v385_v10, %v277_v39 }
 0x1cf   : > { %v394_v13 = vadd.f32 %v392_v12, %v321_v11 }
 0x1d1   : > { %395 = vst.msk [vmem:[#allocation3] sm:$0x1] %vm319_vm3, %v394_v13  ;;  %v400_v16 = vld [vmem:[#allocation2] sm:$0x1] (!%p535_p4) }
 0x1d2   : > { %v401_v17 = vmul.f32 2.0, %v400_v16 }
 0x1d4   : > { %v402_v18 = vadd.f32 1e-05, %v401_v17 }
 0x1d8   : > { %v403_v14 = vld [vmem:[#allocation3] sm:$0x1] }
 0x1d9   : > { %v404_v15 = vadd.f32 1e-05, %v403_v14 }
 0x1db   : > { %656 = vrcp.f32 %v404_v15 }
 0x1e5   : > { %v657_v19 = vpop.eup %656 }
 0x1e6   : > { %v406_v20 = vmul.f32 %v657_v19, %v402_v18 }
 0x1e8   : > { %407 = vst.msk [vmem:[%s1072_s21] sm:$0x1] %vm319_vm3, %v406_v20 }
 0x1e9 PF: > { %s536_s28 = sshll.u32 %s832_s16, 4  ;;  %s421_s7 = sshll.u32 %s1072_s21, 4  ;;  %s422_s7 = int_to_ptr.vmem [resolvable:$true] %s421_s7 }
 0x1ea   : > { %s1091_s26 = scalar_lea.hbm %s1152_s2, %s536_s28  ;;  %s409_s22 = scalar_lea.sflag [#allocation6], %s210_s29 }
 0x1eb   : > { %s718_s25 = scalar_lea.vmem %s422_s7, 16  ;;  %p1171_p3 = scmp.ne.s32.totalorder %s1162_s3, 0 }
 0x1ec   : > { %p719_p11 = scmp.ne.s32.totalorder %s422_s7, %s718_s25  ;;  %s852_s20 = smov [#allocation9]  }
 0x1ed   : > { %s722_s0 = sshll.u32 %s852_s20, 4  ;;  %s723_s0 = int_to_ptr.vmem [resolvable:$false] %s722_s0 }
 0x1ee   : > { %p720_p13 = pnand %p719_p11, %p1171_p3  ;;  %s724_s30 = scalar_lea.vmem %s723_s0, 32 }
 0x1ef   : > { %p725_p5 = scmp.lt.s32.totalorder %s422_s7, %s723_s0  ;;  %p726_p6 = scmp.lt.s32.totalorder %s724_s30, %s718_s25 }
 0x1f0   : > { %p721_p0 = pneg %p720_p13 }
 0x1f1   : > { %p727_p12 = por %p726_p6, %p725_p5 }
 0x1f3   : > { %p728_p2 = pnand %p727_p12, %p721_p0 }
 0x1f5   : > { %731 = shalt.err (!%p728_p2)
}
 0x1f6   : > { %s732_s16 = scalar_lea.hbm %s1091_s26, 16  ;;  %s736_s23 = scalar_lea.hbm %s1152_s2, 32 }
 0x1f7   : > { %p733_p8 = scmp.ne.s32.totalorder %s1091_s26, %s732_s16  ;;  %p737_p9 = scmp.lt.u32.totalorder %s1091_s26, %s1152_s2 }
 0x1f8   : > { %p738_p7 = scmp.lt.u32.totalorder %s736_s23, %s732_s16  ;;  %p740_p11 = scmp.lt.u32.totalorder %s732_s16, %s1091_s26 }
 0x1f9   : > { %p734_p10 = pnand %p733_p8, %p1171_p3 }
 0x1fa   : > { %p739_p4 = por %p738_p7, %p737_p9 }
 0x1fb   : > { %p735_p1 = pneg %p734_p10 }
 0x1fc   : > { %p741_p13 = por %p740_p11, %p739_p4 }
 0x1fe   : > { %p742_p0 = pnand %p741_p13, %p735_p1 }
 0x200   : > { %745 = shalt.err (!%p742_p0)
}
 0x201   : > { %543 = dma.vmem_to_hbm [thread:$0]  (%p1171_p3), %s422_s7, 16, %s1091_s26, %s409_s22  }
 0x202 PF: > { %p557_p5 = scmp.ge.s32.totalorder %s844_s19, 2  ;;  %s433_s21 = sand.u32 1, %s804_s9  }
 0x203   : > { %p1172_p6 = scmp.ne.s32.totalorder %s1163_s6, 0  ;;  %s434_s28 = scalar_lea.sflag [#allocation6], %s433_s21 }
 0x205   : > { %p553_p12 = pnand %p557_p5, %p1172_p6 }
 0x207   : > { %799 = dma.done.wait (!%p553_p12), %s434_s28, 16  }
 0x208   : > { %801 = vsyncadd (!%p553_p12), %s434_s28, 4294967280  ;;  %s21_s19 = sadd.s32 1, %s844_s19   ;;  %s1173_s3 = sld [smem:[#allocation13_spill]] }
 0x209   : > { %p18_p2 = scmp.ge.s32.totalorder %s21_s19, 6   ;;  %s1174_s24 = sld [smem:[#allocation14_spill]] }
 0x20a   : > { %s1175_s9 = smov %s808_s10  ;;  %s1176_s10 = smov %s812_s11 }
 0x20b   : > { %s1177_s11 = smov %s955_s4  ;;  %s1178_s12 = smov %s820_s13 }
 0x20c   : > { %s1179_s13 = smov %s824_s14  ;;  %s1180_s14 = smov %s958_s5 }
 0x20d   : > { %s1181_s15 = smov %s836_s17  ;;  %s1182_s16 = smov %s840_s18 }
 0x20e   : > { %s1183_s17 = smov %s1173_s3  ;;  %20 = sbr.rel (!%p18_p2) target bundleno = 13 (0xd), region = 94 }
 0x20f   : > { %s1184_s18 = smov %s1174_s24 }
 0x215   :  { %438 = vsyncpa [#allocation5], 1 }
 0x216   :  { %440 = vsyncpa [#allocation5 + $0x1], 1 }
 0x217   :  { %441 = vsyncpa [#allocation8], 1 }
 0x218   :  { %443 = vsyncpa [#allocation8 + $0x1], 1 }
 0x219   :  { %444 = vsyncpa [#allocation6], 1 }
 0x21a   :  { %446 = vsyncpa [#allocation6 + $0x1], 1 }

</bundles_post_ra>
